<compile_context>
chip_gen: v7x
topology: tpu7x:2x2x1
jax: 0.10.0
libtpu: 0.0.40
codegen_flags: <defaults>
</compile_context>

<pallas_src>
import functools

import jax
import jax.numpy as jnp
from jax.experimental import pallas as pl
from jax.experimental.pallas import tpu as pltpu

_LANE = 128
_SUBLANE = 8


# --------------------------------------------------------------------------
# Helpers
# --------------------------------------------------------------------------
def _round_up(n, m):
    return (n + m - 1) // m * m


def _vmem_capacity_bytes():
    try:
        return int(pltpu.get_tpu_info().vmem_capacity_bytes)
    except Exception:
        return 64 * 1024 * 1024  # v7x floor; conservative on v5e/v6e


def _pad2(a, rows, cols):
    r, c = a.shape
    if r == rows and c == cols:
        return a
    return jnp.pad(a, ((0, rows - r), (0, cols - c)))


def pack_gru_weights(weight_u, bias_u, weight_r, bias_r, weight, bias, *,
                     input_size, param_dtype=None, lane=_LANE):
    """One-time repack of the PyTorch-layout parameters into fused, lane-
    aligned matrices. Call once per parameter set, NOT per forward step.

    Each gate block is padded to a multiple of `lane` columns (and the hidden
    contraction dim to the same) so in-kernel gate slices and output stores
    are lane-dense. Optionally casts weights to `param_dtype` (e.g. bf16) for
    the fast MXU path; biases stay f32.
    """
    hidden = weight_u.shape[1]
    h_pad = _round_up(hidden, lane)

    def x_part(w):
        return _pad2(w[:input_size], input_size, h_pad)

    def h_part(w):
        return _pad2(w[input_size:], h_pad, h_pad)

    w_x_all = jnp.concatenate(
        [x_part(weight_u), x_part(weight_r), x_part(weight)], axis=1)
    w_h_zr = jnp.concatenate([h_part(weight_u), h_part(weight_r)], axis=1)
    w_h_c = h_part(weight)
    b_all = jnp.concatenate(
        [_pad2(bias_u, 1, h_pad), _pad2(bias_r, 1, h_pad),
         _pad2(bias, 1, h_pad)], axis=1).astype(jnp.float32)

    if param_dtype is not None:
        w_x_all = w_x_all.astype(param_dtype)
        w_h_zr = w_h_zr.astype(param_dtype)
        w_h_c = w_h_c.astype(param_dtype)
    return w_x_all, w_h_zr, w_h_c, b_all


def _pick_batch_tile(batch, per_row_bytes, resident_weight_bytes, vmem_cap):
    """Largest sublane-aligned batch tile that fits the VMEM budget and still
    yields >= 2 grid steps (so both v7x TensorCores get work) when possible."""
    padded = _round_up(max(batch, 1), _SUBLANE)
    budget = max(int(vmem_cap * 0.6) - resident_weight_bytes,
                 _SUBLANE * per_row_bytes)
    max_tb = max(_SUBLANE,
                 (budget // max(per_row_bytes, 1)) // _SUBLANE * _SUBLANE)
    for tb in (1024, 512, 256, 128, 64, 32, 16, 8):
        if tb > max_tb:
            continue
        if padded >= 2 * tb:
            return tb
    return min(padded, max_tb)  # tiny batch: one sublane-aligned tile


# --------------------------------------------------------------------------
# Kernel
# --------------------------------------------------------------------------
def _gru_cell_kernel(x_ref, h_ref, wx_ref, whzr_ref, whc_ref, b_ref, out_ref):
    hp = out_ref.shape[-1]  # lane-aligned (padded) hidden size

    x = x_ref[...]
    h = h_ref[...]
    h32 = h.astype(jnp.float32)

    # x-contribution to all three gates (+ all biases): [tb, 3*hp], f32 acc.
    gates_x = (jnp.dot(x, wx_ref[...], preferred_element_type=jnp.float32)
               + b_ref[...].astype(jnp.float32))
    # h-contribution to the update & reset gates:       [tb, 2*hp], f32 acc.
    gates_h = jnp.dot(h, whzr_ref[...], preferred_element_type=jnp.float32)

    # Lane-aligned slices (hp is a multiple of 128).
    z = jax.nn.sigmoid(gates_x[:, :hp] + gates_h[:, :hp])
    r = jax.nn.sigmoid(gates_x[:, hp:2 * hp] + gates_h[:, hp:])

    # Candidate state: separate matmul on the reset-gated hidden (matches the
    # module's cat(x, r*h) @ W formulation, NOT torch.nn.GRUCell).
    rh = (r * h32).astype(whc_ref.dtype)
    h_hat = jnp.tanh(gates_x[:, 2 * hp:]
                     + jnp.dot(rh, whc_ref[...],
                               preferred_element_type=jnp.float32))

    # h_new = z*h + (1-z)*h_hat, rewritten with one fewer vector multiply.
    out_ref[...] = (h32 + (1.0 - z) * (h_hat - h32)).astype(out_ref.dtype)


# --------------------------------------------------------------------------
# pallas_call wrapper
# --------------------------------------------------------------------------
@functools.partial(
    jax.jit,
    static_argnames=("batch_tile", "single_buffer_weights",
                     "vmem_limit_bytes", "out_dtype"))
def _gru_forward_padded(x, h, w_x_all, w_h_zr, w_h_c, b_all, *, batch_tile,
                        single_buffer_weights, vmem_limit_bytes, out_dtype):
    batch_pad, input_size = x.shape
    h_pad = h.shape[1]
    grid = (batch_pad // batch_tile,)

    def w_spec(a):
        # Constant block index -> DMA'd once, VMEM-resident across all steps.
        if single_buffer_weights:
            return pl.BlockSpec(a.shape, lambda i: (0, 0),
                                pipeline_mode=pl.Buffered(1))
        return pl.BlockSpec(a.shape, lambda i: (0, 0))

    return pl.pallas_call(
        _gru_cell_kernel,
        out_shape=jax.ShapeDtypeStruct((batch_pad, h_pad), out_dtype),
        grid=grid,
        in_specs=[
            pl.BlockSpec((batch_tile, input_size), lambda i: (i, 0)),   # x
            pl.BlockSpec((batch_tile, h_pad), lambda i: (i, 0)),        # h
            w_spec(w_x_all),
            w_spec(w_h_zr),
            w_spec(w_h_c),
            w_spec(b_all),
        ],
        out_specs=pl.BlockSpec((batch_tile, h_pad), lambda i: (i, 0)),
        compiler_params=pltpu.CompilerParams(
            dimension_semantics=("parallel",),
            vmem_limit_bytes=vmem_limit_bytes),
    )(x, h, w_x_all, w_h_zr, w_h_c, b_all)


# Memoized: does this Pallas build accept single-buffered constant operands?
_WEIGHT_SINGLE_BUFFER_OK = [True]


def gru_cell_forward(x, hidden_state, w_x_all, w_h_zr, w_h_c, b_all, *,
                     batch_tile=None, compute_dtype=None):
    """Pallas GRUCell forward with pre-packed (lane-padded) weights.

    x:            [batch, input_size]
    hidden_state: [batch, hidden_size]
    returns:      [batch, hidden_size] in hidden_state.dtype
    """
    batch, input_size = x.shape
    hidden_size = hidden_state.shape[1]
    h_pad = w_h_c.shape[0]
    out_dtype = hidden_state.dtype
    if compute_dtype is None:
        compute_dtype = w_x_all.dtype

    # Pad hidden lane dim; padded lanes stay exactly zero through the kernel.
    x_in = x.astype(compute_dtype)
    h_in = hidden_state
    if hidden_size != h_pad:
        h_in = jnp.pad(h_in, ((0, 0), (0, h_pad - hidden_size)))
    h_in = h_in.astype(compute_dtype)

    # ---- VMEM budgeting & batch-tile selection ----------------------------
    cap = _vmem_capacity_bytes()
    w_bytes = int(w_x_all.size * w_x_all.dtype.itemsize
                  + w_h_zr.size * w_h_zr.dtype.itemsize
                  + w_h_c.size * w_h_c.dtype.itemsize
                  + b_all.size * b_all.dtype.itemsize)
    act = jnp.dtype(compute_dtype).itemsize
    outb = jnp.dtype(out_dtype).itemsize
    per_row = (2 * (input_size + h_pad) * act   # x, h tiles (double-buffered)
               + 2 * h_pad * outb               # output tile (double-buffered)
               + 6 * h_pad * 4)                 # f32 gate intermediates
    if batch_tile is None:
        batch_tile = _pick_batch_tile(batch, per_row, 2 * w_bytes, cap)

    # Ragged batch: pad to a tile multiple (no dropped rows, no giant tile).
    batch_pad = _round_up(batch, batch_tile)
    if batch_pad != batch:
        x_in = jnp.pad(x_in, ((0, batch_pad - batch), (0, 0)))
        h_in = jnp.pad(h_in, ((0, batch_pad - batch), (0, 0)))

    need = 2 * w_bytes + batch_tile * per_row
    vmem_limit = int(min(max(need * 1.25, 32 * 1024 * 1024), 0.9 * cap))

    args = (x_in, h_in, w_x_all, w_h_zr, w_h_c, b_all)
    kwargs = dict(batch_tile=int(batch_tile), vmem_limit_bytes=vmem_limit,
                  out_dtype=out_dtype)

    out = None
    if _WEIGHT_SINGLE_BUFFER_OK[0]:
        try:
            out = _gru_forward_padded(*args, single_buffer_weights=True,
                                      **kwargs)
            out = jax.block_until_ready(out)
        except Exception:
            _WEIGHT_SINGLE_BUFFER_OK[0] = False
            out = None
    if out is None:
        out = _gru_forward_padded(*args, single_buffer_weights=False, **kwargs)

    return out[:batch, :hidden_size]


def gru_cell_apply(x, hidden_state, weight_u, bias_u, weight_r, bias_r,
                   weight, bias, *, param_dtype=None, compute_dtype=None):
    """Convenience wrapper taking the original (PyTorch-layout) parameters.
    Note: packs weights per call — hoist pack_gru_weights() in real use."""
    packed = pack_gru_weights(weight_u, bias_u, weight_r, bias_r, weight, bias,
                              input_size=x.shape[1], param_dtype=param_dtype)
    return gru_cell_forward(x, hidden_state, *packed,
                            compute_dtype=compute_dtype)


# --------------------------------------------------------------------------
# Reference + demo
# --------------------------------------------------------------------------
def _reference_gru(x, h, weight_u, bias_u, weight_r, bias_r, weight, bias):
    cat = jnp.concatenate((x, h), axis=1)
    z = jax.nn.sigmoid(cat @ weight_u + bias_u)
    r = jax.nn.sigmoid(cat @ weight_r + bias_r)
    cat2 = jnp.concatenate((x, r * h), axis=1)
    h_hat = jnp.tanh(cat2 @ weight + bias)
    return z * h + (1.0 - z) * h_hat


if __name__ == "__main__":
    input_size = 64
    hidden_size = 32
    hpi = hidden_size + input_size  # hidden_pluss_input

    key = jax.random.PRNGKey(0)
    kx, kh, ku, kr, kw, kx2, kh2 = jax.random.split(key, 7)

    # Deterministic synthetic parameters (same init scheme as the module).
    scale = 1.0 / jnp.sqrt(jnp.float32(hpi))
    weight_u = jax.random.normal(ku, (hpi, hidden_size), jnp.float32) * scale
    weight_r = jax.random.normal(kr, (hpi, hidden_size), jnp.float32) * scale
    weight = jax.random.normal(kw, (hpi, hidden_size), jnp.float32) * scale
    bias_u = jnp.zeros((1, hidden_size), jnp.float32)
    bias_r = jnp.zeros((1, hidden_size), jnp.float32)
    bias = jnp.zeros((1, hidden_size), jnp.float32)

    packed_f32 = pack_gru_weights(weight_u, bias_u, weight_r, bias_r,
                                  weight, bias, input_size=input_size)

    # --- Case 1: tiny batch, f32 path (exact check) ------------------------
    batch = 2
    x = jax.random.normal(kx, (batch, input_size), jnp.float32)
    h0 = jax.random.normal(kh, (batch, hidden_size), jnp.float32)
    out = jax.block_until_ready(gru_cell_forward(x, h0, *packed_f32))
    ref = _reference_gru(x, h0, weight_u, bias_u, weight_r, bias_r,
                         weight, bias)
    assert out.shape == (batch, hidden_size)
    assert jnp.allclose(out, ref, atol=2e-5, rtol=1e-5), (
        float(jnp.max(jnp.abs(out - ref))))

    # --- Case 2: ragged batch -> padded, multi-tile ("parallel") grid ------
    batch2 = 50
    x2 = jax.random.normal(kx2, (batch2, input_size), jnp.float32)
    h2 = jax.random.normal(kh2, (batch2, hidden_size), jnp.float32)
    out2 = jax.block_until_ready(gru_cell_forward(x2, h2, *packed_f32))
    ref2 = _reference_gru(x2, h2, weight_u, bias_u, weight_r, bias_r,
                          weight, bias)
    assert out2.shape == (batch2, hidden_size)
    assert jnp.allclose(out2, ref2, atol=5e-5, rtol=1e-4), (
        float(jnp.max(jnp.abs(out2 - ref2))))

    # --- Case 3: bf16 weights/activations, f32 MXU accumulation ------------
    packed_bf16 = pack_gru_weights(weight_u, bias_u, weight_r, bias_r,
                                   weight, bias, input_size=input_size,
                                   param_dtype=jnp.bfloat16)
    out_bf16 = jax.block_until_ready(
        gru_cell_forward(x2, h2, *packed_bf16, compute_dtype=jnp.bfloat16))
    assert out_bf16.shape == (batch2, hidden_size)
    assert jnp.allclose(out_bf16.astype(jnp.float32), ref2,
                        atol=1e-1, rtol=1e-1), (
        float(jnp.max(jnp.abs(out_bf16.astype(jnp.float32) - ref2))))

    print("KERNEL_OK")
</pallas_src>

<mosaic_0001>
module attributes {stable_mosaic.version = 11 : i64} {
  func.func @_gru_cell_kernel(%arg0: i32, %arg1: memref<8x64xf32, #tpu.memory_space<vmem>>, %arg2: memref<8x128xf32, #tpu.memory_space<vmem>>, %arg3: memref<64x384xf32, #tpu.memory_space<vmem>>, %arg4: memref<128x256xf32, #tpu.memory_space<vmem>>, %arg5: memref<128x128xf32, #tpu.memory_space<vmem>>, %arg6: memref<1x384xf32, #tpu.memory_space<vmem>>, %arg7: memref<8x128xf32, #tpu.memory_space<vmem>>) attributes {dimension_semantics = [#tpu.dimension_semantics<parallel>], iteration_bounds = array<i64: 1>, scalar_prefetch = 0 : i64, scratch_operands = 0 : i64, tpu.core_type = #tpu.core_type<tc>, window_params = [{transform_indices = @transform_0, window_bounds = array<i64: 8, 64>}, {transform_indices = @transform_1, window_bounds = array<i64: 8, 128>}, {pipeline_mode = #tpu.pipeline_mode<synchronous>, transform_indices = @transform_2, window_bounds = array<i64: 64, 384>}, {pipeline_mode = #tpu.pipeline_mode<synchronous>, transform_indices = @transform_3, window_bounds = array<i64: 128, 256>}, {pipeline_mode = #tpu.pipeline_mode<synchronous>, transform_indices = @transform_4, window_bounds = array<i64: 128, 128>}, {pipeline_mode = #tpu.pipeline_mode<synchronous>, transform_indices = @transform_5, window_bounds = array<i64: 1, 384>}, {transform_indices = @transform_6, window_bounds = array<i64: 8, 128>}]} {
    %c0 = arith.constant 0 : index
    %c0_0 = arith.constant 0 : index
    %0 = vector.load %arg1[%c0, %c0_0] : memref<8x64xf32, #tpu.memory_space<vmem>>, vector<8x64xf32>
    %c0_1 = arith.constant 0 : index
    %c0_2 = arith.constant 0 : index
    %1 = vector.load %arg2[%c0_1, %c0_2] : memref<8x128xf32, #tpu.memory_space<vmem>>, vector<8x128xf32>
    %c0_3 = arith.constant 0 : index
    %c0_4 = arith.constant 0 : index
    %2 = vector.load %arg3[%c0_3, %c0_4] : memref<64x384xf32, #tpu.memory_space<vmem>>, vector<64x384xf32>
    %cst = arith.constant dense<0.000000e+00> : vector<8x384xf32>
    %3 = tpu.matmul %0, %2, %cst {dimension_numbers = #tpu.dot_dimension_numbers<[1], [0], [0], [1], [0, 0, 1, 1], [], []>} : vector<8x64xf32>, vector<64x384xf32>, vector<8x384xf32> -> vector<8x384xf32>
    %c0_5 = arith.constant 0 : index
    %c0_6 = arith.constant 0 : index
    %4 = vector.load %arg6[%c0_5, %c0_6] : memref<1x384xf32, #tpu.memory_space<vmem>>, vector<1x384xf32>
    %5 = vector.broadcast %4 : vector<1x384xf32> to vector<8x384xf32>
    %6 = arith.addf %3, %5 : vector<8x384xf32>
    %c0_7 = arith.constant 0 : index
    %c0_8 = arith.constant 0 : index
    %7 = vector.load %arg4[%c0_7, %c0_8] : memref<128x256xf32, #tpu.memory_space<vmem>>, vector<128x256xf32>
    %cst_9 = arith.constant dense<0.000000e+00> : vector<8x256xf32>
    %8 = tpu.matmul %1, %7, %cst_9 {dimension_numbers = #tpu.dot_dimension_numbers<[1], [0], [0], [1], [0, 0, 1, 1], [], []>} : vector<8x128xf32>, vector<128x256xf32>, vector<8x256xf32> -> vector<8x256xf32>
    %9 = vector.extract_strided_slice %6 {offsets = [0, 0], sizes = [8, 128], strides = [1, 1]} : vector<8x384xf32> to vector<8x128xf32>
    %10 = vector.extract_strided_slice %8 {offsets = [0, 0], sizes = [8, 128], strides = [1, 1]} : vector<8x256xf32> to vector<8x128xf32>
    %11 = arith.addf %9, %10 : vector<8x128xf32>
    %12 = arith.negf %11 : vector<8x128xf32>
    %13 = math.exp %12 : vector<8x128xf32>
    %cst_10 = arith.constant 1.000000e+00 : f32
    %14 = vector.broadcast %cst_10 : f32 to vector<8x128xf32>
    %15 = arith.addf %14, %13 : vector<8x128xf32>
    %16 = arith.divf %14, %15 : vector<8x128xf32>
    %17 = vector.extract_strided_slice %6 {offsets = [0, 128], sizes = [8, 128], strides = [1, 1]} : vector<8x384xf32> to vector<8x128xf32>
    %18 = vector.extract_strided_slice %8 {offsets = [0, 128], sizes = [8, 128], strides = [1, 1]} : vector<8x256xf32> to vector<8x128xf32>
    %19 = arith.addf %17, %18 : vector<8x128xf32>
    %20 = arith.negf %19 : vector<8x128xf32>
    %21 = math.exp %20 : vector<8x128xf32>
    %cst_11 = arith.constant 1.000000e+00 : f32
    %22 = vector.broadcast %cst_11 : f32 to vector<8x128xf32>
    %23 = arith.addf %22, %21 : vector<8x128xf32>
    %24 = arith.divf %22, %23 : vector<8x128xf32>
    %25 = arith.mulf %24, %1 : vector<8x128xf32>
    %26 = vector.extract_strided_slice %6 {offsets = [0, 256], sizes = [8, 128], strides = [1, 1]} : vector<8x384xf32> to vector<8x128xf32>
    %c0_12 = arith.constant 0 : index
    %c0_13 = arith.constant 0 : index
    %27 = vector.load %arg5[%c0_12, %c0_13] : memref<128x128xf32, #tpu.memory_space<vmem>>, vector<128x128xf32>
    %cst_14 = arith.constant dense<0.000000e+00> : vector<8x128xf32>
    %28 = tpu.matmul %25, %27, %cst_14 {dimension_numbers = #tpu.dot_dimension_numbers<[1], [0], [0], [1], [0, 0, 1, 1], [], []>} : vector<8x128xf32>, vector<128x128xf32>, vector<8x128xf32> -> vector<8x128xf32>
    %29 = arith.addf %26, %28 : vector<8x128xf32>
    %30 = math.tanh %29 : vector<8x128xf32>
    %cst_15 = arith.constant 1.000000e+00 : f32
    %31 = vector.broadcast %cst_15 : f32 to vector<8x128xf32>
    %32 = arith.subf %31, %16 : vector<8x128xf32>
    %33 = arith.subf %30, %1 : vector<8x128xf32>
    %34 = arith.mulf %32, %33 : vector<8x128xf32>
    %35 = arith.addf %1, %34 : vector<8x128xf32>
    %c0_16 = arith.constant 0 : index
    %c0_17 = arith.constant 0 : index
    %36 = vector.load %arg7[%c0_16, %c0_17] : memref<8x128xf32, #tpu.memory_space<vmem>>, vector<8x128xf32>
    tpu.vector_store %arg7[%c0_16, %c0_17], %35 {strides = array<i32>} : memref<8x128xf32, #tpu.memory_space<vmem>>, vector<8x128xf32>,
    return
  }
  func.func @transform_0(%arg0: i32) -> (i32, i32) {
    %c0_i32 = arith.constant 0 : i32
    %c0_i32_0 = arith.constant 0 : i32
    return %arg0, %c0_i32 : i32, i32
  }
  func.func @transform_1(%arg0: i32) -> (i32, i32) {
    %c0_i32 = arith.constant 0 : i32
    %c0_i32_0 = arith.constant 0 : i32
    return %arg0, %c0_i32 : i32, i32
  }
  func.func @transform_2(%arg0: i32) -> (i32, i32) {
    %c0_i32 = arith.constant 0 : i32
    %c0_i32_0 = arith.constant 0 : i32
    %c0_i32_1 = arith.constant 0 : i32
    return %c0_i32, %c0_i32_0 : i32, i32
  }
  func.func @transform_3(%arg0: i32) -> (i32, i32) {
    %c0_i32 = arith.constant 0 : i32
    %c0_i32_0 = arith.constant 0 : i32
    %c0_i32_1 = arith.constant 0 : i32
    return %c0_i32, %c0_i32_0 : i32, i32
  }
  func.func @transform_4(%arg0: i32) -> (i32, i32) {
    %c0_i32 = arith.constant 0 : i32
    %c0_i32_0 = arith.constant 0 : i32
    %c0_i32_1 = arith.constant 0 : i32
    return %c0_i32, %c0_i32_0 : i32, i32
  }
  func.func @transform_5(%arg0: i32) -> (i32, i32) {
    %c0_i32 = arith.constant 0 : i32
    %c0_i32_0 = arith.constant 0 : i32
    %c0_i32_1 = arith.constant 0 : i32
    return %c0_i32, %c0_i32_0 : i32, i32
  }
  func.func @transform_6(%arg0: i32) -> (i32, i32) {
    %c0_i32 = arith.constant 0 : i32
    %c0_i32_0 = arith.constant 0 : i32
    return %arg0, %c0_i32 : i32, i32
  }
}

module attributes {stable_mosaic.version = 11 : i64} {
  func.func @_gru_cell_kernel(%arg0: i32, %arg1: memref<8x64xf32, #tpu.memory_space<vmem>>, %arg2: memref<8x128xf32, #tpu.memory_space<vmem>>, %arg3: memref<64x384xf32, #tpu.memory_space<vmem>>, %arg4: memref<128x256xf32, #tpu.memory_space<vmem>>, %arg5: memref<128x128xf32, #tpu.memory_space<vmem>>, %arg6: memref<1x384xf32, #tpu.memory_space<vmem>>, %arg7: memref<8x128xf32, #tpu.memory_space<vmem>>) attributes {dimension_semantics = [#tpu.dimension_semantics<parallel>], iteration_bounds = array<i64: 1>, scalar_prefetch = 0 : i64, scratch_operands = 0 : i64, tpu.core_type = #tpu.core_type<tc>, window_params = [{transform_indices = @transform_0, window_bounds = array<i64: 8, 64>}, {transform_indices = @transform_1, window_bounds = array<i64: 8, 128>}, {pipeline_mode = #tpu.pipeline_mode<synchronous>, transform_indices = @transform_2, window_bounds = array<i64: 64, 384>}, {pipeline_mode = #tpu.pipeline_mode<synchronous>, transform_indices = @transform_3, window_bounds = array<i64: 128, 256>}, {pipeline_mode = #tpu.pipeline_mode<synchronous>, transform_indices = @transform_4, window_bounds = array<i64: 128, 128>}, {pipeline_mode = #tpu.pipeline_mode<synchronous>, transform_indices = @transform_5, window_bounds = array<i64: 1, 384>}, {transform_indices = @transform_6, window_bounds = array<i64: 8, 128>}]} {
    %c0 = arith.constant 0 : index
    %c0_0 = arith.constant 0 : index
    %0 = vector.load %arg1[%c0, %c0_0] : memref<8x64xf32, #tpu.memory_space<vmem>>, vector<8x64xf32>
    %c0_1 = arith.constant 0 : index
    %c0_2 = arith.constant 0 : index
    %1 = vector.load %arg2[%c0_1, %c0_2] : memref<8x128xf32, #tpu.memory_space<vmem>>, vector<8x128xf32>
    %c0_3 = arith.constant 0 : index
    %c0_4 = arith.constant 0 : index
    %2 = vector.load %arg3[%c0_3, %c0_4] : memref<64x384xf32, #tpu.memory_space<vmem>>, vector<64x384xf32>
    %cst = arith.constant dense<0.000000e+00> : vector<8x384xf32>
    %3 = tpu.matmul %0, %2, %cst {dimension_numbers = #tpu.dot_dimension_numbers<[1], [0], [0], [1], [0, 0, 1, 1], [], []>} : vector<8x64xf32>, vector<64x384xf32>, vector<8x384xf32> -> vector<8x384xf32>
    %c0_5 = arith.constant 0 : index
    %c0_6 = arith.constant 0 : index
    %4 = vector.load %arg6[%c0_5, %c0_6] : memref<1x384xf32, #tpu.memory_space<vmem>>, vector<1x384xf32>
    %5 = vector.broadcast %4 : vector<1x384xf32> to vector<8x384xf32>
    %6 = arith.addf %3, %5 : vector<8x384xf32>
    %c0_7 = arith.constant 0 : index
    %c0_8 = arith.constant 0 : index
    %7 = vector.load %arg4[%c0_7, %c0_8] : memref<128x256xf32, #tpu.memory_space<vmem>>, vector<128x256xf32>
    %cst_9 = arith.constant dense<0.000000e+00> : vector<8x256xf32>
    %8 = tpu.matmul %1, %7, %cst_9 {dimension_numbers = #tpu.dot_dimension_numbers<[1], [0], [0], [1], [0, 0, 1, 1], [], []>} : vector<8x128xf32>, vector<128x256xf32>, vector<8x256xf32> -> vector<8x256xf32>
    %9 = vector.extract_strided_slice %6 {offsets = [0, 0], sizes = [8, 128], strides = [1, 1]} : vector<8x384xf32> to vector<8x128xf32>
    %10 = vector.extract_strided_slice %8 {offsets = [0, 0], sizes = [8, 128], strides = [1, 1]} : vector<8x256xf32> to vector<8x128xf32>
    %11 = arith.addf %9, %10 : vector<8x128xf32>
    %12 = arith.negf %11 : vector<8x128xf32>
    %13 = math.exp %12 : vector<8x128xf32>
    %cst_10 = arith.constant 1.000000e+00 : f32
    %14 = vector.broadcast %cst_10 : f32 to vector<8x128xf32>
    %15 = arith.addf %14, %13 : vector<8x128xf32>
    %16 = arith.divf %14, %15 : vector<8x128xf32>
    %17 = vector.extract_strided_slice %6 {offsets = [0, 128], sizes = [8, 128], strides = [1, 1]} : vector<8x384xf32> to vector<8x128xf32>
    %18 = vector.extract_strided_slice %8 {offsets = [0, 128], sizes = [8, 128], strides = [1, 1]} : vector<8x256xf32> to vector<8x128xf32>
    %19 = arith.addf %17, %18 : vector<8x128xf32>
    %20 = arith.negf %19 : vector<8x128xf32>
    %21 = math.exp %20 : vector<8x128xf32>
    %cst_11 = arith.constant 1.000000e+00 : f32
    %22 = vector.broadcast %cst_11 : f32 to vector<8x128xf32>
    %23 = arith.addf %22, %21 : vector<8x128xf32>
    %24 = arith.divf %22, %23 : vector<8x128xf32>
    %25 = arith.mulf %24, %1 : vector<8x128xf32>
    %26 = vector.extract_strided_slice %6 {offsets = [0, 256], sizes = [8, 128], strides = [1, 1]} : vector<8x384xf32> to vector<8x128xf32>
    %c0_12 = arith.constant 0 : index
    %c0_13 = arith.constant 0 : index
    %27 = vector.load %arg5[%c0_12, %c0_13] : memref<128x128xf32, #tpu.memory_space<vmem>>, vector<128x128xf32>
    %cst_14 = arith.constant dense<0.000000e+00> : vector<8x128xf32>
    %28 = tpu.matmul %25, %27, %cst_14 {dimension_numbers = #tpu.dot_dimension_numbers<[1], [0], [0], [1], [0, 0, 1, 1], [], []>} : vector<8x128xf32>, vector<128x128xf32>, vector<8x128xf32> -> vector<8x128xf32>
    %29 = arith.addf %26, %28 : vector<8x128xf32>
    %30 = math.tanh %29 : vector<8x128xf32>
    %cst_15 = arith.constant 1.000000e+00 : f32
    %31 = vector.broadcast %cst_15 : f32 to vector<8x128xf32>
    %32 = arith.subf %31, %16 : vector<8x128xf32>
    %33 = arith.subf %30, %1 : vector<8x128xf32>
    %34 = arith.mulf %32, %33 : vector<8x128xf32>
    %35 = arith.addf %1, %34 : vector<8x128xf32>
    %c0_16 = arith.constant 0 : index
    %c0_17 = arith.constant 0 : index
    %36 = vector.load %arg7[%c0_16, %c0_17] : memref<8x128xf32, #tpu.memory_space<vmem>>, vector<8x128xf32>
    tpu.vector_store %arg7[%c0_16, %c0_17], %35 {strides = array<i32>} : memref<8x128xf32, #tpu.memory_space<vmem>>, vector<8x128xf32>,
    return
  }
  func.func @transform_0(%arg0: i32) -> (i32, i32) {
    %c0_i32 = arith.constant 0 : i32
    %c0_i32_0 = arith.constant 0 : i32
    return %arg0, %c0_i32 : i32, i32
  }
  func.func @transform_1(%arg0: i32) -> (i32, i32) {
    %c0_i32 = arith.constant 0 : i32
    %c0_i32_0 = arith.constant 0 : i32
    return %arg0, %c0_i32 : i32, i32
  }
  func.func @transform_2(%arg0: i32) -> (i32, i32) {
    %c0_i32 = arith.constant 0 : i32
    %c0_i32_0 = arith.constant 0 : i32
    %c0_i32_1 = arith.constant 0 : i32
    return %c0_i32, %c0_i32_0 : i32, i32
  }
  func.func @transform_3(%arg0: i32) -> (i32, i32) {
    %c0_i32 = arith.constant 0 : i32
    %c0_i32_0 = arith.constant 0 : i32
    %c0_i32_1 = arith.constant 0 : i32
    return %c0_i32, %c0_i32_0 : i32, i32
  }
  func.func @transform_4(%arg0: i32) -> (i32, i32) {
    %c0_i32 = arith.constant 0 : i32
    %c0_i32_0 = arith.constant 0 : i32
    %c0_i32_1 = arith.constant 0 : i32
    return %c0_i32, %c0_i32_0 : i32, i32
  }
  func.func @transform_5(%arg0: i32) -> (i32, i32) {
    %c0_i32 = arith.constant 0 : i32
    %c0_i32_0 = arith.constant 0 : i32
    %c0_i32_1 = arith.constant 0 : i32
    return %c0_i32, %c0_i32_0 : i32, i32
  }
  func.func @transform_6(%arg0: i32) -> (i32, i32) {
    %c0_i32 = arith.constant 0 : i32
    %c0_i32_0 = arith.constant 0 : i32
    return %arg0, %c0_i32 : i32, i32
  }
}

</mosaic_0001>

<bundles_post_ra>
// kernel: _gru_forward_padded.1
= control target key start
LH: loop header
LB: loop body
LE: loop exit
PB: predicated region body
PF: predicated region fallthrough
CT: control target
= control target key end

     0   :  { %11 = vsyncpa [#allocation3], 0  ;;  %s1013_s0 = inlined_call_operand.hbm [shape: f32[8,64], index: 0, kind: input, shape index: {}]   ;;  %s1014_s1 = inlined_call_operand.hbm [shape: f32[8,128], index: 1, kind: input, shape index: {}]   ;;  %s1015_s2 = inlined_call_operand.hbm [shape: f32[64,384], index: 2, kind: input, shape index: {}]   ;;  %s1016_s3 = inlined_call_operand.hbm [shape: f32[128,256], index: 3, kind: input, shape index: {}]   ;;  %s1017_s4 = inlined_call_operand.hbm [shape: f32[128,128], index: 4, kind: input, shape index: {}]   ;;  %s1018_s5 = inlined_call_operand.vmem [shape: f32[1,384], index: 5, kind: input, shape index: {}]   ;;  %s1019_s6 = inlined_call_operand.hbm [shape: f32[8,128], index: 6, kind: output, shape index: {}]  }
   0x1   :  { %12 = vsyncpa [#allocation6], 0 }
   0x2   :  { %13 = vsyncpa [#allocation9], 0 }
   0x3   :  { %14 = vsyncpa [#allocation4], 0  ;;  %s844_s21 = smov [#allocation5]   ;;  %s845_s23 = smov [#allocation8]  }
   0x4   :  { %s31_s22 = sshll.u32 %s844_s21, 4  ;;  %s52_s24 = sshll.u32 %s845_s23, 4  ;;  %s32_s22 = int_to_ptr.vmem [resolvable:$true] %s31_s22  ;;  %s894_s24 = int_to_ptr.vmem [resolvable:$true] %s52_s24 }
   0x5   :  { %s704_s27 = scalar_lea.hbm %s1014_s1, 128 }
   0x6   :  { %p705_p0 = scmp.ne.s32.totalorder %s1014_s1, %s704_s27  ;;  %p708_p1 = scmp.lt.u32.totalorder %s704_s27, %s1014_s1 }
   0x8   :  { %p710_p2 = pnand %p708_p1, %p705_p0 }
   0xa   :  { %713 = shalt.err (!%p710_p2)
}
   0xb   :  { %s714_s8 = scalar_lea.vmem %s32_s22, 128  ;;  %p719_p4 = scmp.lt.s32.totalorder %s32_s22, %s32_s22 }
   0xc   :  { %p715_p3 = scmp.ne.s32.totalorder %s32_s22, %s714_s8  ;;  %p720_p5 = scmp.lt.s32.totalorder %s714_s8, %s714_s8 }
   0xe   :  { %p721_p6 = por %p720_p5, %p719_p4 }
  0x10   :  { %p722_p7 = pnand %p721_p6, %p715_p3 }
  0x12   :  { %725 = shalt.err (!%p722_p7)
}
  0x13   :  { %34 = dma.hbm_to_vmem [thread:$0]  %s1014_s1, 128, %s32_s22, [#allocation6]  }
  0x14   :  { %s726_s13 = scalar_lea.hbm %s1016_s3, 4096 }
  0x15   :  { %p727_p8 = scmp.ne.s32.totalorder %s1016_s3, %s726_s13  ;;  %p730_p9 = scmp.lt.u32.totalorder %s726_s13, %s1016_s3 }
  0x17   :  { %p732_p10 = pnand %p730_p9, %p727_p8 }
  0x19   :  { %735 = shalt.err (!%p732_p10)
}
  0x1a   :  { %s736_s18 = scalar_lea.vmem %s894_s24, 4096  ;;  %p741_p12 = scmp.lt.s32.totalorder %s894_s24, %s894_s24 }
  0x1b   :  { %p737_p11 = scmp.ne.s32.totalorder %s894_s24, %s736_s18  ;;  %p742_p13 = scmp.lt.s32.totalorder %s736_s18, %s736_s18 }
  0x1d   :  { %p743_p0 = por %p742_p13, %p741_p12 }
  0x1f   :  { %p744_p1 = pnand %p743_p0, %p737_p11 }
  0x21   :  { %747 = shalt.err (!%p744_p1)
}
  0x22   :  { %s846_s1 = smov 256   ;;  %s847_s19 = smov 16  }
  0x23   :  { %58 = dma.hbm_to_vmem [thread:$0]  %s1016_s3, 4096, %s894_s24, [#allocation9], %s846_s1, %s846_s1, %s847_s19  }
  0x24   :  { %s848_s22 = smov [#allocation2]   ;;  %s849_s25 = smov [#allocation7]  }
  0x25   :  { %s21_s23 = sshll.u32 %s848_s22, 4  ;;  %s40_s26 = sshll.u32 %s849_s25, 4  ;;  %s22_s23 = int_to_ptr.vmem [resolvable:$true] %s21_s23  ;;  %s925_s26 = int_to_ptr.vmem [resolvable:$true] %s40_s26 }
  0x26   :  { %s748_s29 = scalar_lea.hbm %s1013_s0, 128 }
  0x27   :  { %p749_p2 = scmp.ne.s32.totalorder %s1013_s0, %s748_s29  ;;  %p752_p3 = scmp.lt.u32.totalorder %s748_s29, %s1013_s0 }
  0x29   :  { %p754_p4 = pnand %p752_p3, %p749_p2 }
  0x2b   :  { %757 = shalt.err (!%p754_p4)
}
  0x2c   :  { %s758_s3 = scalar_lea.vmem %s22_s23, 128  ;;  %p763_p6 = scmp.lt.s32.totalorder %s22_s23, %s22_s23 }
  0x2d   :  { %p759_p5 = scmp.ne.s32.totalorder %s22_s23, %s758_s3  ;;  %p764_p7 = scmp.lt.s32.totalorder %s758_s3, %s758_s3 }
  0x2f   :  { %p765_p8 = por %p764_p7, %p763_p6 }
  0x31   :  { %p766_p9 = pnand %p765_p8, %p759_p5 }
  0x33   :  { %769 = shalt.err (!%p766_p9)
}
  0x34   :  { %24 = dma.hbm_to_vmem [thread:$0]  %s1013_s0, 128, %s22_s23, [#allocation3]  }
  0x35   :  { %s770_s13 = scalar_lea.hbm %s1015_s2, 3072 }
  0x36   :  { %p771_p10 = scmp.ne.s32.totalorder %s1015_s2, %s770_s13  ;;  %p774_p11 = scmp.lt.u32.totalorder %s770_s13, %s1015_s2 }
  0x38   :  { %p776_p12 = pnand %p774_p11, %p771_p10 }
  0x3a   :  { %779 = shalt.err (!%p776_p12)
}
  0x3b   :  { %s780_s18 = scalar_lea.vmem %s925_s26, 3072  ;;  %p785_p0 = scmp.lt.s32.totalorder %s925_s26, %s925_s26 }
  0x3c   :  { %p781_p13 = scmp.ne.s32.totalorder %s925_s26, %s780_s18  ;;  %p786_p1 = scmp.lt.s32.totalorder %s780_s18, %s780_s18 }
  0x3e   :  { %p787_p2 = por %p786_p1, %p785_p0 }
  0x40   :  { %p788_p3 = pnand %p787_p2, %p781_p13 }
  0x42   :  { %791 = shalt.err (!%p788_p3)
}
  0x43   :  { %s850_s0 = smov 384   ;;  %s851_s1 = smov 24  }
  0x44   :  { %46 = dma.hbm_to_vmem [thread:$0]  %s1015_s2, 3072, %s925_s26, [#allocation6], %s850_s0, %s850_s0, %s851_s1  }
  0x45   :  { %s852_s21 = smov [#allocation10]   ;;  %s792_s27 = scalar_lea.hbm %s1017_s4, 2048 }
  0x46   :  { %s64_s22 = sshll.u32 %s852_s21, 4  ;;  %p793_p4 = scmp.ne.s32.totalorder %s1017_s4, %s792_s27  ;;  %s65_s22 = int_to_ptr.vmem [resolvable:$true] %s64_s22 }
  0x47   :  { %p796_p5 = scmp.lt.u32.totalorder %s792_s27, %s1017_s4 }
  0x49   :  { %p798_p6 = pnand %p796_p5, %p793_p4 }
  0x4b   :  { %801 = shalt.err (!%p798_p6)
}
  0x4c   :  { %s802_s8 = scalar_lea.vmem %s65_s22, 2048  ;;  %p807_p8 = scmp.lt.s32.totalorder %s65_s22, %s65_s22 }
  0x4d   :  { %p803_p7 = scmp.ne.s32.totalorder %s65_s22, %s802_s8  ;;  %p808_p9 = scmp.lt.s32.totalorder %s802_s8, %s802_s8 }
  0x4f   :  { %p809_p10 = por %p808_p9, %p807_p8 }
  0x51   :  { %p810_p11 = pnand %p809_p10, %p803_p7 }
  0x53   :  { %813 = shalt.err (!%p810_p11)
}
  0x54   :  { %s853_s2 = smov 128   ;;  %s854_s26 = smov 8  }
  0x55   :  { %70 = dma.hbm_to_vmem [thread:$0]  %s1017_s4, 2048, %s65_s22, [#allocation9], %s853_s2, %s853_s2, %s854_s26  }
  0x56   :  { %836 = dma.done.wait [#allocation3], 128  }
  0x57   :  { %837 = vsyncadd [#allocation3], 4294967168 }
  0x58   :  { %838 = dma.done.wait [#allocation6], 3200  }
  0x59   :  { %839 = vsyncadd [#allocation6], 4294964096 }
  0x5a   :  { %840 = dma.done.wait [#allocation9], 6144  }
  0x5b   :  { %841 = vsyncadd [#allocation9], 4294961152  ;;  %v855_v0 = vmov 0.0   ;;  %v856_v1 = vmov 0.0|0.0   ;;  %vm857_vm0 = vmmov 0   ;;  %v91_v2 = vld [vmem:[#allocation7 + $0x8] sm:$0xff] }
  0x5c   :  { %199 = vmatprep.mubr.f32.mxu0 %v855_v0  ;;  %604 = vmatprep.subr.bf16.mxu1 %v856_v1  ;;  %v94_v3 = vld [vmem:[#allocation7 + $0x20] sm:$0xff]  ;;  %v93_v6 = vld [vmem:[#allocation7 + $0x18] sm:$0xff]  ;;  %v100_v8 = vld [vmem:[#allocation7 + $0x50] sm:$0xff]  ;;  %vm131_vm1 = vcmask 523264  }
  0x5d   :  { %550 = vmatprep.mubr.msk.f32.mxu1 %vm857_vm0, %v855_v0  ;;  %v90_v4 = vld [vmem:[#allocation7] sm:$0xff]  ;;  %v588_v5 = vpack.c.bf16 %v94_v3, %v91_v2  ;;  %v97_v7 = vld [vmem:[#allocation7 + $0x38] sm:$0xff]  ;;  %v96_v11 = vld [vmem:[#allocation7 + $0x30] sm:$0xff] }
  0x5e   :  { %v590_v9 = vpack.c.bf16 %v93_v6, %v90_v4  ;;  %v592_v10 = vpack.c.bf16 %v100_v8, %v97_v7  ;;  %v99_v12 = vld [vmem:[#allocation7 + $0x48] sm:$0xff]  ;;  %v106_v14 = vld [vmem:[#allocation7 + $0x80] sm:$0xff]  ;;  %v105_v18 = vld [vmem:[#allocation7 + $0x78] sm:$0xff] }
  0x5f   :  { %v103_v13 = vld [vmem:[#allocation7 + $0x68] sm:$0xff]  ;;  %589 = vmatprep.subr.bf16.mxu0 %v588_v5  ;;  %v594_v15 = vpack.c.bf16 %v99_v12, %v96_v11  ;;  %v102_v17 = vld [vmem:[#allocation7 + $0x60] sm:$0xff]  ;;  %v109_v19 = vld [vmem:[#allocation7 + $0x98] sm:$0xff] }
  0x60   :  { %591 = vmatpush1.bf16.msra.mxu0 %v590_v9  ;;  %v596_v16 = vpack.c.bf16 %v106_v14, %v103_v13  ;;  %v112_v20 = vld [vmem:[#allocation7 + $0xb0] sm:$0xff]  ;;  %v598_v21 = vpack.c.bf16 %v105_v18, %v102_v17  ;;  %v111_v24 = vld [vmem:[#allocation7 + $0xa8] sm:$0xff]  ;;  %v279_v26 = vld [vmem:[#allocation8 + $0x18] sm:$0xff] }
  0x61   :  { %593 = vmatprep.subr.bf16.mxu0 %v592_v10  ;;  %v600_v22 = vpack.c.bf16 %v112_v20, %v109_v19  ;;  %v108_v23 = vld [vmem:[#allocation7 + $0x90] sm:$0xff]  ;;  %v277_v25 = vld [vmem:[#allocation8 + $0x8] sm:$0xff]  ;;  %v276_v29 = vld [vmem:[#allocation8] sm:$0xff] }
  0x62   :  { %v602_v27 = vpack.c.bf16 %v111_v24, %v108_v23  ;;  %v616_v28 = vpack.c.bf16 %v279_v26, %v277_v25  ;;  %v278_v30 = vld [vmem:[#allocation8 + $0x10] sm:$0xff]  ;;  %v281_v31 = vld [vmem:[#allocation8 + $0x28] sm:$0xff]  ;;  %v283_v32 = vld [vmem:[#allocation8 + $0x38] sm:$0xff] }
  0x63   :  { %v972_v33 = vld [vmem:[#allocation2] sm:$0xff]  ;;  %v618_v34 = vpack.c.bf16 %v278_v30, %v276_v29  ;;  %v280_v35 = vld [vmem:[#allocation8 + $0x20] sm:$0xff]  ;;  %v620_v37 = vpack.c.bf16 %v283_v32, %v281_v31  ;;  %v285_v39 = vld [vmem:[#allocation8 + $0x48] sm:$0xff] }
  0x64   :  { %595 = vmatpush1.bf16.msra.mxu0 %v594_v15  ;;  %v92_v36 = vld [vmem:[#allocation7 + $0x10] sm:$0xff]  ;;  %v95_v40 = vld [vmem:[#allocation7 + $0x28] sm:$0xff]  ;;  %v287_v41 = vld [vmem:[#allocation8 + $0x58] sm:$0xff] }
  0x65   :  { %597 = vmatprep.subr.bf16.mxu0 %v596_v16  ;;  %v282_v38 = vld [vmem:[#allocation8 + $0x30] sm:$0xff]  ;;  %v605_v42 = vpack.c.bf16 %v95_v40, %v92_v36  ;;  %v98_v43 = vld [vmem:[#allocation7 + $0x40] sm:$0xff]  ;;  %v101_v44 = vld [vmem:[#allocation7 + $0x58] sm:$0xff]  ;;  %v624_v46 = vpack.c.bf16 %v287_v41, %v285_v39 }
  0x66   :  { %v622_v45 = vpack.c.bf16 %v282_v38, %v280_v35  ;;  %v284_v47 = vld [vmem:[#allocation8 + $0x40] sm:$0xff]  ;;  %v286_v48 = vld [vmem:[#allocation8 + $0x50] sm:$0xff]  ;;  %v289_v49 = vld [vmem:[#allocation8 + $0x68] sm:$0xff]  ;;  %v608_v50 = vpack.c.bf16 %v101_v44, %v98_v43 }
  0x67   :  { %606 = vmatpush3.bf16.msra.mxu1 %v605_v42  ;;  %v291_v51 = vld [vmem:[#allocation8 + $0x78] sm:$0xff]  ;;  %v104_v52 = vld [vmem:[#allocation7 + $0x70] sm:$0xff]  ;;  %v107_v53 = vld [vmem:[#allocation7 + $0x88] sm:$0xff]  ;;  %v626_v54 = vpack.c.bf16 %v286_v48, %v284_v47 }
  0x68   :  { %599 = vmatpush1.bf16.msra.mxu0 %v598_v21  ;;  %607 = vmatprep.subr.bf16.mxu1 %v856_v1  ;;  %v628_v55 = vpack.c.bf16 %v291_v51, %v289_v49  ;;  %v288_v56 = vld [vmem:[#allocation8 + $0x60] sm:$0xff]  ;;  %v290_v57 = vld [vmem:[#allocation8 + $0x70] sm:$0xff]  ;;  %v293_v58 = vld [vmem:[#allocation8 + $0x88] sm:$0xff]  ;;  %v611_v59 = vpack.c.bf16 %v107_v53, %v104_v52  ;;  %v116_v49 = vlaneseq }
  0x69   :  { %601 = vmatprep.subr.bf16.mxu0 %v600_v22  ;;  %v295_v60 = vld [vmem:[#allocation8 + $0x98] sm:$0xff]  ;;  %v110_v61 = vld [vmem:[#allocation7 + $0xa0] sm:$0xff]  ;;  %v630_v63 = vpack.c.bf16 %v290_v57, %v288_v56  ;;  %v294_v4 = vld [vmem:[#allocation8 + $0x90] sm:$0xff] }
  0x6a   :  { %v113_v62 = vld [vmem:[#allocation7 + $0xb8] sm:$0xff]  ;;  %v632_v2 = vpack.c.bf16 %v295_v60, %v293_v58  ;;  %v292_v3 = vld [vmem:[#allocation8 + $0x80] sm:$0xff]  ;;  %v297_v6 = vld [vmem:[#allocation8 + $0xa8] sm:$0xff] }
  0x6b   :  { %609 = vmatpush3.bf16.msra.mxu1 %v608_v50  ;;  %v614_v5 = vpack.c.bf16 %v113_v62, %v110_v61  ;;  %v299_v7 = vld [vmem:[#allocation8 + $0xb8] sm:$0xff]  ;;  %v634_v8 = vpack.c.bf16 %v294_v4, %v292_v3  ;;  %v296_v10 = vld [vmem:[#allocation8 + $0xa0] sm:$0xff]  ;;  %v298_v11 = vld [vmem:[#allocation8 + $0xb0] sm:$0xff]  ;;  %v117_v50 = vshrl.u32 %v116_v49, 7 }
  0x6c   :  { %603 = vmatpush1.bf16.msra.mxu0 %v602_v27  ;;  %610 = vmatprep.subr.bf16.mxu1 %v856_v1  ;;  %v636_v9 = vpack.c.bf16 %v299_v7, %v297_v6  ;;  %v301_v12 = vld [vmem:[#allocation8 + $0xc8] sm:$0xff]  ;;  %v303_v13 = vld [vmem:[#allocation8 + $0xd8] sm:$0xff]  ;;  %v638_v14 = vpack.c.bf16 %v298_v11, %v296_v10  ;;  %v300_v16 = vld [vmem:[#allocation8 + $0xc0] sm:$0xff] }
  0x6d   :  { %617 = vmatprep.subr.bf16.mxu0 %v616_v28  ;;  %v640_v15 = vpack.c.bf16 %v303_v13, %v301_v12  ;;  %v302_v17 = vld [vmem:[#allocation8 + $0xd0] sm:$0xff]  ;;  %v305_v18 = vld [vmem:[#allocation8 + $0xe8] sm:$0xff]  ;;  %v307_v19 = vld [vmem:[#allocation8 + $0xf8] sm:$0xff]  ;;  %v122_v51 = vsub.s32 1, %v117_v50  ;;  %v118_v61 = vsub.s32 0, %v117_v50  ;;  %v126_v3 = vsub.s32 2, %v117_v50 }
  0x6e   :  { %v642_v20 = vpack.c.bf16 %v302_v17, %v300_v16  ;;  %v644_v21 = vpack.c.bf16 %v307_v19, %v305_v18  ;;  %v304_v22 = vld [vmem:[#allocation8 + $0xe0] sm:$0xff]  ;;  %v306_v23 = vld [vmem:[#allocation8 + $0xf0] sm:$0xff]  ;;  %v985_v25 = vld [vmem:[#allocation5] sm:$0xff] }
  0x6f   :  { %504 = vmatmul.mubr.msk.f32.vlgmr.msra.gmra.mrb[0].mxu0 %vm131_vm1, %v972_v33  ;;  %612 = vmatpush3.bf16.msra.mxu1 %v611_v59  ;;  %v646_v24 = vpack.c.bf16 %v306_v23, %v304_v22  ;;  %v394_v26 = vld [vmem:[#allocation10] sm:$0xff]  ;;  %v395_v27 = vld [vmem:[#allocation10 + $0x8] sm:$0xff]  ;;  %v397_v29 = vld [vmem:[#allocation10 + $0x18] sm:$0xff] }
  0x70   :  { %619 = vmatpush1.bf16.msra.mxu0 %v618_v34  ;;  %372 = vmatprep.mubr.f32.mxu0 %v855_v0  ;;  %v649_v28 = vpack.c.bf16 %v395_v27, %v394_v26  ;;  %v398_v31 = vld [vmem:[#allocation10 + $0x20] sm:$0xff]  ;;  %v399_v32 = vld [vmem:[#allocation10 + $0x28] sm:$0xff]  ;;  %v400_v34 = vld [vmem:[#allocation10 + $0x30] sm:$0xff] }
  0x71   :  { %621 = vmatprep.subr.bf16.mxu0 %v620_v37  ;;  %613 = vmatprep.subr.bf16.mxu1 %v856_v1  ;;  %v401_v35 = vld [vmem:[#allocation10 + $0x38] sm:$0xff]  ;;  %v402_v37 = vld [vmem:[#allocation10 + $0x40] sm:$0xff]  ;;  %v403_v38 = vld [vmem:[#allocation10 + $0x48] sm:$0xff] }
  0x72   :  { %v658_v36 = vpack.c.bf16 %v401_v35, %v400_v34  ;;  %v661_v39 = vpack.c.bf16 %v403_v38, %v402_v37  ;;  %v404_v40 = vld [vmem:[#allocation10 + $0x50] sm:$0xff]  ;;  %v405_v41 = vld [vmem:[#allocation10 + $0x58] sm:$0xff]  ;;  %v406_v43 = vld [vmem:[#allocation10 + $0x60] sm:$0xff] }
  0x73   :  { %615 = vmatpush3.bf16.msra.mxu1 %v614_v5  ;;  %v664_v42 = vpack.c.bf16 %v405_v41, %v404_v40  ;;  %v407_v44 = vld [vmem:[#allocation10 + $0x68] sm:$0xff]  ;;  %v409_v47 = vld [vmem:[#allocation10 + $0x78] sm:$0xff]  ;;  %v114_v52 = vld [vmem:[%s1018_s5] sm:$0x7]  ;;  %s858_s5 = smov [#allocation11]  }
  0x74   :  { %623 = vmatpush1.bf16.msra.mxu0 %v622_v45  ;;  %648 = vmatprep.subr.bf16.mxu1 %v856_v1  ;;  %v667_v45 = vpack.c.bf16 %v407_v44, %v406_v43  ;;  %v123_v53 = vrot.slane %v114_v52, %v122_v51  ;;  %v119_v62 = vrot.slane %v114_v52, %v118_v61  ;;  %s493_s10 = sshll.u32 %s858_s5, 4  ;;  %s494_s10 = int_to_ptr.vmem [resolvable:$true] %s493_s10 }
  0x75   :  { %625 = vmatprep.subr.bf16.mxu0 %v624_v46  ;;  %v408_v46 = vld [vmem:[#allocation10 + $0x70] sm:$0xff]  ;;  %v127_v6 = vrot.slane %v114_v52, %v126_v3  ;;  %s814_s11 = scalar_lea.vmem %s494_s10, 128  ;;  %p819_p13 = scmp.lt.s32.totalorder %s494_s10, %s494_s10 }
  0x76   :  { %551 = vmatmul.mubr.msk.f32.vlgmr.msra.gmra.mrb[0].mxu1 %vm131_vm1, %v972_v33  ;;  %v655_v33 = vpack.c.bf16 %v399_v32, %v398_v31  ;;  %v670_v48 = vpack.c.bf16 %v409_v47, %v408_v46  ;;  %p815_p12 = scmp.ne.s32.totalorder %s494_s10, %s814_s11  ;;  %p820_p0 = scmp.lt.s32.totalorder %s814_s11, %s814_s11 }
  0x77   :  { %585 = vmatprep.mubr.msk.f32.mxu1 %vm857_vm0, %v855_v0  ;;  %650 = vmatpush3.bf16.msra.mxu1 %v649_v28  ;;  %v396_v0 = vld [vmem:[#allocation10 + $0x10] sm:$0xff] }
  0x78   :  { %627 = vmatpush1.bf16.msra.mxu0 %v626_v54  ;;  %651 = vmatprep.subr.bf16.mxu1 %v856_v1  ;;  %v652_v30 = vpack.c.bf16 %v397_v29, %v396_v0  ;;  %p821_p1 = por %p820_p0, %p819_p13 }
  0x79   :  { %629 = vmatprep.subr.bf16.mxu0 %v628_v55 }
  0x7a   :  { %p822_p2 = pnand %p821_p1, %p815_p12 }
  0x7b   :  { %653 = vmatpush3.bf16.msra.mxu1 %v652_v30 }
  0x7c   :  { %631 = vmatpush1.bf16.msra.mxu0 %v630_v63  ;;  %654 = vmatprep.subr.bf16.mxu1 %v856_v1 }
  0x7d   :  { %633 = vmatprep.subr.bf16.mxu0 %v632_v2 }
  0x7f   :  { %656 = vmatpush3.bf16.msra.mxu1 %v655_v33 }
  0x80   :  { %635 = vmatpush1.bf16.msra.mxu0 %v634_v8  ;;  %657 = vmatprep.subr.bf16.mxu1 %v856_v1 }
  0x81   :  { %637 = vmatprep.subr.bf16.mxu0 %v636_v9 }
  0x83   :  { %659 = vmatpush3.bf16.msra.mxu1 %v658_v36 }
  0x84   :  { %639 = vmatpush1.bf16.msra.mxu0 %v638_v14  ;;  %660 = vmatprep.subr.bf16.mxu1 %v856_v1 }
  0x85   :  { %641 = vmatprep.subr.bf16.mxu0 %v640_v15 }
  0x87   :  { %662 = vmatpush3.bf16.msra.mxu1 %v661_v39 }
  0x88   :  { %643 = vmatpush1.bf16.msra.mxu0 %v642_v20  ;;  %663 = vmatprep.subr.bf16.mxu1 %v856_v1 }
  0x89   :  { %645 = vmatprep.subr.bf16.mxu0 %v644_v21 }
  0x8b   :  { %665 = vmatpush3.bf16.msra.mxu1 %v664_v42 }
  0x8c   :  { %647 = vmatpush1.bf16.msra.mxu0 %v646_v24  ;;  %666 = vmatprep.subr.bf16.mxu1 %v856_v1 }
  0x8f   :  { %373 = vmatmul.mubr.f32.vlgmr.msra.gmra.mrb[0].mxu0 %v985_v25  ;;  %668 = vmatpush3.bf16.msra.mxu1 %v667_v45 }
  0x90   :  { %669 = vmatprep.subr.bf16.mxu1 %v856_v1 }
  0x93   :  { %671 = vmatpush3.bf16.msra.mxu1 %v670_v48 }
 0x162   :  { %v374_v54 = vpop.f32.mrb[0].mxu0 }
 0x163   :  { %v376_v55 = vpop.f32.mrb[1].mxu0  ;;  %v672_v63 = vadd.f32 %v374_v54, %v119_v62 }
 0x164   :  { %v673_v56 = vadd.f32 %v376_v55, %v123_v53 }
 0x165   :  { %v506_v2 = vmul.f32 -1.442695, %v672_v63 }
 0x166   :  { %v507_v57 = vmul.f32 -1.442695, %v673_v56 }
 0x168   :  { %694 = vpow2.f32 %v507_v57 }
 0x172   :  { %v695_v58 = vpop.eup %694 }
 0x173   :  { %v390_v59 = vadd.f32 1.0, %v695_v58 }
 0x175   :  { %696 = vrcp.f32 %v390_v59 }
 0x176   :  { %698 = vpow2.f32 %v506_v2 }
 0x17f   :  { %v697_v1 = vpop.eup %696 }
 0x180   :  { %v393_v60 = vmul.f32 %v697_v1, %v985_v25  ;;  %v699_v4 = vpop.eup %698 }
 0x181   :  { %v383_v5 = vadd.f32 1.0, %v699_v4 }
 0x182   :  { %586 = vmatmul.mubr.f32.vlgmr.msra.gmra.mrb[0].mxu1 %v393_v60 }
 0x183   :  { %700 = vrcp.f32 %v383_v5 }
 0x18d   :  { %v701_v10 = vpop.eup %700 }
 0x18e   :  { %v482_v12 = vsub.f32 1.0, %v701_v10 }
 0x255   :  { %v476_v7 = vpop.f32.mrb[0].mxu1 }
 0x256   :  { %v674_v8 = vadd.f32 %v476_v7, %v127_v6  ;;  %v587_v9 = vpop.f32.mrb[1].mxu1 }
 0x258   :  { %702 = vtanh.f32 %v674_v8 }
 0x262   :  { %v703_v11 = vpop.eup %702 }
 0x263   :  { %v483_v13 = vsub.f32 %v703_v11, %v985_v25 }
 0x265   :  { %v484_v14 = vmul.f32 %v483_v13, %v482_v12 }
 0x267   :  { %v485_v15 = vadd.f32 %v484_v14, %v985_v25 }
 0x269   :  { %486 = vst [vmem:[#allocation11] sm:$0xff] %v485_v15 }
 0x26a   :  { %825 = shalt.err (!%p822_p2)
}
 0x26b   :  { %s826_s14 = scalar_lea.hbm %s1019_s6, 128 }
 0x26c   :  { %p827_p3 = scmp.ne.s32.totalorder %s1019_s6, %s826_s14  ;;  %p830_p4 = scmp.lt.u32.totalorder %s826_s14, %s1019_s6 }
 0x26e   :  { %p832_p5 = pnand %p830_p4, %p827_p3 }
 0x270   :  { %835 = shalt.err (!%p832_p5)
}
 0x271   :  { %496 = dma.vmem_to_hbm [thread:$0]  %s494_s10, 128, %s1019_s6, [#allocation4]  }
 0x272   :  { %842 = dma.done.wait [#allocation4], 128  }
 0x273   :  { %843 = vsyncadd [#allocation4], 4294967168 }
 0x274   :  { %500 = vsyncpa [#allocation3], 1 }
 0x275   :  { %501 = vsyncpa [#allocation6], 1 }
 0x276   :  { %502 = vsyncpa [#allocation9], 1 }
 0x277   :  { %503 = vsyncpa [#allocation4], 1 }

// kernel: _gru_forward_padded.1
= control target key start
LH: loop header
LB: loop body
LE: loop exit
PB: predicated region body
PF: predicated region fallthrough
CT: control target
= control target key end

     0   :  { %11 = vsyncpa [#allocation3], 0  ;;  %s1013_s0 = inlined_call_operand.hbm [shape: f32[8,64], index: 0, kind: input, shape index: {}]   ;;  %s1014_s1 = inlined_call_operand.hbm [shape: f32[8,128], index: 1, kind: input, shape index: {}]   ;;  %s1015_s2 = inlined_call_operand.hbm [shape: f32[64,384], index: 2, kind: input, shape index: {}]   ;;  %s1016_s3 = inlined_call_operand.hbm [shape: f32[128,256], index: 3, kind: input, shape index: {}]   ;;  %s1017_s4 = inlined_call_operand.hbm [shape: f32[128,128], index: 4, kind: input, shape index: {}]   ;;  %s1018_s5 = inlined_call_operand.vmem [shape: f32[1,384], index: 5, kind: input, shape index: {}]   ;;  %s1019_s6 = inlined_call_operand.hbm [shape: f32[8,128], index: 6, kind: output, shape index: {}]  }
   0x1   :  { %12 = vsyncpa [#allocation6], 0 }
   0x2   :  { %13 = vsyncpa [#allocation9], 0 }
   0x3   :  { %14 = vsyncpa [#allocation4], 0  ;;  %s844_s21 = smov [#allocation5]   ;;  %s845_s23 = smov [#allocation8]  }
   0x4   :  { %s31_s22 = sshll.u32 %s844_s21, 4  ;;  %s52_s24 = sshll.u32 %s845_s23, 4  ;;  %s32_s22 = int_to_ptr.vmem [resolvable:$true] %s31_s22  ;;  %s894_s24 = int_to_ptr.vmem [resolvable:$true] %s52_s24 }
   0x5   :  { %s704_s27 = scalar_lea.hbm %s1014_s1, 128 }
   0x6   :  { %p705_p0 = scmp.ne.s32.totalorder %s1014_s1, %s704_s27  ;;  %p708_p1 = scmp.lt.u32.totalorder %s704_s27, %s1014_s1 }
   0x8   :  { %p710_p2 = pnand %p708_p1, %p705_p0 }
   0xa   :  { %713 = shalt.err (!%p710_p2)
}
   0xb   :  { %s714_s8 = scalar_lea.vmem %s32_s22, 128  ;;  %p719_p4 = scmp.lt.s32.totalorder %s32_s22, %s32_s22 }
   0xc   :  { %p715_p3 = scmp.ne.s32.totalorder %s32_s22, %s714_s8  ;;  %p720_p5 = scmp.lt.s32.totalorder %s714_s8, %s714_s8 }
   0xe   :  { %p721_p6 = por %p720_p5, %p719_p4 }
  0x10   :  { %p722_p7 = pnand %p721_p6, %p715_p3 }
  0x12   :  { %725 = shalt.err (!%p722_p7)
}
  0x13   :  { %34 = dma.hbm_to_vmem [thread:$0]  %s1014_s1, 128, %s32_s22, [#allocation6]  }
  0x14   :  { %s726_s13 = scalar_lea.hbm %s1016_s3, 4096 }
  0x15   :  { %p727_p8 = scmp.ne.s32.totalorder %s1016_s3, %s726_s13  ;;  %p730_p9 = scmp.lt.u32.totalorder %s726_s13, %s1016_s3 }
  0x17   :  { %p732_p10 = pnand %p730_p9, %p727_p8 }
  0x19   :  { %735 = shalt.err (!%p732_p10)
}
  0x1a   :  { %s736_s18 = scalar_lea.vmem %s894_s24, 4096  ;;  %p741_p12 = scmp.lt.s32.totalorder %s894_s24, %s894_s24 }
  0x1b   :  { %p737_p11 = scmp.ne.s32.totalorder %s894_s24, %s736_s18  ;;  %p742_p13 = scmp.lt.s32.totalorder %s736_s18, %s736_s18 }
  0x1d   :  { %p743_p0 = por %p742_p13, %p741_p12 }
  0x1f   :  { %p744_p1 = pnand %p743_p0, %p737_p11 }
  0x21   :  { %747 = shalt.err (!%p744_p1)
}
  0x22   :  { %s846_s1 = smov 256   ;;  %s847_s19 = smov 16  }
  0x23   :  { %58 = dma.hbm_to_vmem [thread:$0]  %s1016_s3, 4096, %s894_s24, [#allocation9], %s846_s1, %s846_s1, %s847_s19  }
  0x24   :  { %s848_s22 = smov [#allocation2]   ;;  %s849_s25 = smov [#allocation7]  }
  0x25   :  { %s21_s23 = sshll.u32 %s848_s22, 4  ;;  %s40_s26 = sshll.u32 %s849_s25, 4  ;;  %s22_s23 = int_to_ptr.vmem [resolvable:$true] %s21_s23  ;;  %s925_s26 = int_to_ptr.vmem [resolvable:$true] %s40_s26 }
  0x26   :  { %s748_s29 = scalar_lea.hbm %s1013_s0, 128 }
  0x27   :  { %p749_p2 = scmp.ne.s32.totalorder %s1013_s0, %s748_s29  ;;  %p752_p3 = scmp.lt.u32.totalorder %s748_s29, %s1013_s0 }
  0x29   :  { %p754_p4 = pnand %p752_p3, %p749_p2 }
  0x2b   :  { %757 = shalt.err (!%p754_p4)
}
  0x2c   :  { %s758_s3 = scalar_lea.vmem %s22_s23, 128  ;;  %p763_p6 = scmp.lt.s32.totalorder %s22_s23, %s22_s23 }
  0x2d   :  { %p759_p5 = scmp.ne.s32.totalorder %s22_s23, %s758_s3  ;;  %p764_p7 = scmp.lt.s32.totalorder %s758_s3, %s758_s3 }
  0x2f   :  { %p765_p8 = por %p764_p7, %p763_p6 }
  0x31   :  { %p766_p9 = pnand %p765_p8, %p759_p5 }
  0x33   :  { %769 = shalt.err (!%p766_p9)
}
  0x34   :  { %24 = dma.hbm_to_vmem [thread:$0]  %s1013_s0, 128, %s22_s23, [#allocation3]  }
  0x35   :  { %s770_s13 = scalar_lea.hbm %s1015_s2, 3072 }
  0x36   :  { %p771_p10 = scmp.ne.s32.totalorder %s1015_s2, %s770_s13  ;;  %p774_p11 = scmp.lt.u32.totalorder %s770_s13, %s1015_s2 }
  0x38   :  { %p776_p12 = pnand %p774_p11, %p771_p10 }
  0x3a   :  { %779 = shalt.err (!%p776_p12)
}
  0x3b   :  { %s780_s18 = scalar_lea.vmem %s925_s26, 3072  ;;  %p785_p0 = scmp.lt.s32.totalorder %s925_s26, %s925_s26 }
  0x3c   :  { %p781_p13 = scmp.ne.s32.totalorder %s925_s26, %s780_s18  ;;  %p786_p1 = scmp.lt.s32.totalorder %s780_s18, %s780_s18 }
  0x3e   :  { %p787_p2 = por %p786_p1, %p785_p0 }
  0x40   :  { %p788_p3 = pnand %p787_p2, %p781_p13 }
  0x42   :  { %791 = shalt.err (!%p788_p3)
}
  0x43   :  { %s850_s0 = smov 384   ;;  %s851_s1 = smov 24  }
  0x44   :  { %46 = dma.hbm_to_vmem [thread:$0]  %s1015_s2, 3072, %s925_s26, [#allocation6], %s850_s0, %s850_s0, %s851_s1  }
  0x45   :  { %s852_s21 = smov [#allocation10]   ;;  %s792_s27 = scalar_lea.hbm %s1017_s4, 2048 }
  0x46   :  { %s64_s22 = sshll.u32 %s852_s21, 4  ;;  %p793_p4 = scmp.ne.s32.totalorder %s1017_s4, %s792_s27  ;;  %s65_s22 = int_to_ptr.vmem [resolvable:$true] %s64_s22 }
  0x47   :  { %p796_p5 = scmp.lt.u32.totalorder %s792_s27, %s1017_s4 }
  0x49   :  { %p798_p6 = pnand %p796_p5, %p793_p4 }
  0x4b   :  { %801 = shalt.err (!%p798_p6)
}
  0x4c   :  { %s802_s8 = scalar_lea.vmem %s65_s22, 2048  ;;  %p807_p8 = scmp.lt.s32.totalorder %s65_s22, %s65_s22 }
  0x4d   :  { %p803_p7 = scmp.ne.s32.totalorder %s65_s22, %s802_s8  ;;  %p808_p9 = scmp.lt.s32.totalorder %s802_s8, %s802_s8 }
  0x4f   :  { %p809_p10 = por %p808_p9, %p807_p8 }
  0x51   :  { %p810_p11 = pnand %p809_p10, %p803_p7 }
  0x53   :  { %813 = shalt.err (!%p810_p11)
}
  0x54   :  { %s853_s2 = smov 128   ;;  %s854_s26 = smov 8  }
  0x55   :  { %70 = dma.hbm_to_vmem [thread:$0]  %s1017_s4, 2048, %s65_s22, [#allocation9], %s853_s2, %s853_s2, %s854_s26  }
  0x56   :  { %836 = dma.done.wait [#allocation3], 128  }
  0x57   :  { %837 = vsyncadd [#allocation3], 4294967168 }
  0x58   :  { %838 = dma.done.wait [#allocation6], 3200  }
  0x59   :  { %839 = vsyncadd [#allocation6], 4294964096 }
  0x5a   :  { %840 = dma.done.wait [#allocation9], 6144  }
  0x5b   :  { %841 = vsyncadd [#allocation9], 4294961152  ;;  %v855_v0 = vmov 0.0   ;;  %v856_v1 = vmov 0.0|0.0   ;;  %vm857_vm0 = vmmov 0   ;;  %v91_v2 = vld [vmem:[#allocation7 + $0x8] sm:$0xff] }
  0x5c   :  { %199 = vmatprep.mubr.f32.mxu0 %v855_v0  ;;  %604 = vmatprep.subr.bf16.mxu1 %v856_v1  ;;  %v94_v3 = vld [vmem:[#allocation7 + $0x20] sm:$0xff]  ;;  %v93_v6 = vld [vmem:[#allocation7 + $0x18] sm:$0xff]  ;;  %v100_v8 = vld [vmem:[#allocation7 + $0x50] sm:$0xff]  ;;  %vm131_vm1 = vcmask 523264  }
  0x5d   :  { %550 = vmatprep.mubr.msk.f32.mxu1 %vm857_vm0, %v855_v0  ;;  %v90_v4 = vld [vmem:[#allocation7] sm:$0xff]  ;;  %v588_v5 = vpack.c.bf16 %v94_v3, %v91_v2  ;;  %v97_v7 = vld [vmem:[#allocation7 + $0x38] sm:$0xff]  ;;  %v96_v11 = vld [vmem:[#allocation7 + $0x30] sm:$0xff] }
  0x5e   :  { %v590_v9 = vpack.c.bf16 %v93_v6, %v90_v4  ;;  %v592_v10 = vpack.c.bf16 %v100_v8, %v97_v7  ;;  %v99_v12 = vld [vmem:[#allocation7 + $0x48] sm:$0xff]  ;;  %v106_v14 = vld [vmem:[#allocation7 + $0x80] sm:$0xff]  ;;  %v105_v18 = vld [vmem:[#allocation7 + $0x78] sm:$0xff] }
  0x5f   :  { %v103_v13 = vld [vmem:[#allocation7 + $0x68] sm:$0xff]  ;;  %589 = vmatprep.subr.bf16.mxu0 %v588_v5  ;;  %v594_v15 = vpack.c.bf16 %v99_v12, %v96_v11  ;;  %v102_v17 = vld [vmem:[#allocation7 + $0x60] sm:$0xff]  ;;  %v109_v19 = vld [vmem:[#allocation7 + $0x98] sm:$0xff] }
  0x60   :  { %591 = vmatpush1.bf16.msra.mxu0 %v590_v9  ;;  %v596_v16 = vpack.c.bf16 %v106_v14, %v103_v13  ;;  %v112_v20 = vld [vmem:[#allocation7 + $0xb0] sm:$0xff]  ;;  %v598_v21 = vpack.c.bf16 %v105_v18, %v102_v17  ;;  %v111_v24 = vld [vmem:[#allocation7 + $0xa8] sm:$0xff]  ;;  %v279_v26 = vld [vmem:[#allocation8 + $0x18] sm:$0xff] }
  0x61   :  { %593 = vmatprep.subr.bf16.mxu0 %v592_v10  ;;  %v600_v22 = vpack.c.bf16 %v112_v20, %v109_v19  ;;  %v108_v23 = vld [vmem:[#allocation7 + $0x90] sm:$0xff]  ;;  %v277_v25 = vld [vmem:[#allocation8 + $0x8] sm:$0xff]  ;;  %v276_v29 = vld [vmem:[#allocation8] sm:$0xff] }
  0x62   :  { %v602_v27 = vpack.c.bf16 %v111_v24, %v108_v23  ;;  %v616_v28 = vpack.c.bf16 %v279_v26, %v277_v25  ;;  %v278_v30 = vld [vmem:[#allocation8 + $0x10] sm:$0xff]  ;;  %v281_v31 = vld [vmem:[#allocation8 + $0x28] sm:$0xff]  ;;  %v283_v32 = vld [vmem:[#allocation8 + $0x38] sm:$0xff] }
  0x63   :  { %v972_v33 = vld [vmem:[#allocation2] sm:$0xff]  ;;  %v618_v34 = vpack.c.bf16 %v278_v30, %v276_v29  ;;  %v280_v35 = vld [vmem:[#allocation8 + $0x20] sm:$0xff]  ;;  %v620_v37 = vpack.c.bf16 %v283_v32, %v281_v31  ;;  %v285_v39 = vld [vmem:[#allocation8 + $0x48] sm:$0xff] }
  0x64   :  { %595 = vmatpush1.bf16.msra.mxu0 %v594_v15  ;;  %v92_v36 = vld [vmem:[#allocation7 + $0x10] sm:$0xff]  ;;  %v95_v40 = vld [vmem:[#allocation7 + $0x28] sm:$0xff]  ;;  %v287_v41 = vld [vmem:[#allocation8 + $0x58] sm:$0xff] }
  0x65   :  { %597 = vmatprep.subr.bf16.mxu0 %v596_v16  ;;  %v282_v38 = vld [vmem:[#allocation8 + $0x30] sm:$0xff]  ;;  %v605_v42 = vpack.c.bf16 %v95_v40, %v92_v36  ;;  %v98_v43 = vld [vmem:[#allocation7 + $0x40] sm:$0xff]  ;;  %v101_v44 = vld [vmem:[#allocation7 + $0x58] sm:$0xff]  ;;  %v624_v46 = vpack.c.bf16 %v287_v41, %v285_v39 }
  0x66   :  { %v622_v45 = vpack.c.bf16 %v282_v38, %v280_v35  ;;  %v284_v47 = vld [vmem:[#allocation8 + $0x40] sm:$0xff]  ;;  %v286_v48 = vld [vmem:[#allocation8 + $0x50] sm:$0xff]  ;;  %v289_v49 = vld [vmem:[#allocation8 + $0x68] sm:$0xff]  ;;  %v608_v50 = vpack.c.bf16 %v101_v44, %v98_v43 }
  0x67   :  { %606 = vmatpush3.bf16.msra.mxu1 %v605_v42  ;;  %v291_v51 = vld [vmem:[#allocation8 + $0x78] sm:$0xff]  ;;  %v104_v52 = vld [vmem:[#allocation7 + $0x70] sm:$0xff]  ;;  %v107_v53 = vld [vmem:[#allocation7 + $0x88] sm:$0xff]  ;;  %v626_v54 = vpack.c.bf16 %v286_v48, %v284_v47 }
  0x68   :  { %599 = vmatpush1.bf16.msra.mxu0 %v598_v21  ;;  %607 = vmatprep.subr.bf16.mxu1 %v856_v1  ;;  %v628_v55 = vpack.c.bf16 %v291_v51, %v289_v49  ;;  %v288_v56 = vld [vmem:[#allocation8 + $0x60] sm:$0xff]  ;;  %v290_v57 = vld [vmem:[#allocation8 + $0x70] sm:$0xff]  ;;  %v293_v58 = vld [vmem:[#allocation8 + $0x88] sm:$0xff]  ;;  %v611_v59 = vpack.c.bf16 %v107_v53, %v104_v52  ;;  %v116_v49 = vlaneseq }
  0x69   :  { %601 = vmatprep.subr.bf16.mxu0 %v600_v22  ;;  %v295_v60 = vld [vmem:[#allocation8 + $0x98] sm:$0xff]  ;;  %v110_v61 = vld [vmem:[#allocation7 + $0xa0] sm:$0xff]  ;;  %v630_v63 = vpack.c.bf16 %v290_v57, %v288_v56  ;;  %v294_v4 = vld [vmem:[#allocation8 + $0x90] sm:$0xff] }
  0x6a   :  { %v113_v62 = vld [vmem:[#allocation7 + $0xb8] sm:$0xff]  ;;  %v632_v2 = vpack.c.bf16 %v295_v60, %v293_v58  ;;  %v292_v3 = vld [vmem:[#allocation8 + $0x80] sm:$0xff]  ;;  %v297_v6 = vld [vmem:[#allocation8 + $0xa8] sm:$0xff] }
  0x6b   :  { %609 = vmatpush3.bf16.msra.mxu1 %v608_v50  ;;  %v614_v5 = vpack.c.bf16 %v113_v62, %v110_v61  ;;  %v299_v7 = vld [vmem:[#allocation8 + $0xb8] sm:$0xff]  ;;  %v634_v8 = vpack.c.bf16 %v294_v4, %v292_v3  ;;  %v296_v10 = vld [vmem:[#allocation8 + $0xa0] sm:$0xff]  ;;  %v298_v11 = vld [vmem:[#allocation8 + $0xb0] sm:$0xff]  ;;  %v117_v50 = vshrl.u32 %v116_v49, 7 }
  0x6c   :  { %603 = vmatpush1.bf16.msra.mxu0 %v602_v27  ;;  %610 = vmatprep.subr.bf16.mxu1 %v856_v1  ;;  %v636_v9 = vpack.c.bf16 %v299_v7, %v297_v6  ;;  %v301_v12 = vld [vmem:[#allocation8 + $0xc8] sm:$0xff]  ;;  %v303_v13 = vld [vmem:[#allocation8 + $0xd8] sm:$0xff]  ;;  %v638_v14 = vpack.c.bf16 %v298_v11, %v296_v10  ;;  %v300_v16 = vld [vmem:[#allocation8 + $0xc0] sm:$0xff] }
  0x6d   :  { %617 = vmatprep.subr.bf16.mxu0 %v616_v28  ;;  %v640_v15 = vpack.c.bf16 %v303_v13, %v301_v12  ;;  %v302_v17 = vld [vmem:[#allocation8 + $0xd0] sm:$0xff]  ;;  %v305_v18 = vld [vmem:[#allocation8 + $0xe8] sm:$0xff]  ;;  %v307_v19 = vld [vmem:[#allocation8 + $0xf8] sm:$0xff]  ;;  %v122_v51 = vsub.s32 1, %v117_v50  ;;  %v118_v61 = vsub.s32 0, %v117_v50  ;;  %v126_v3 = vsub.s32 2, %v117_v50 }
  0x6e   :  { %v642_v20 = vpack.c.bf16 %v302_v17, %v300_v16  ;;  %v644_v21 = vpack.c.bf16 %v307_v19, %v305_v18  ;;  %v304_v22 = vld [vmem:[#allocation8 + $0xe0] sm:$0xff]  ;;  %v306_v23 = vld [vmem:[#allocation8 + $0xf0] sm:$0xff]  ;;  %v985_v25 = vld [vmem:[#allocation5] sm:$0xff] }
  0x6f   :  { %504 = vmatmul.mubr.msk.f32.vlgmr.msra.gmra.mrb[0].mxu0 %vm131_vm1, %v972_v33  ;;  %612 = vmatpush3.bf16.msra.mxu1 %v611_v59  ;;  %v646_v24 = vpack.c.bf16 %v306_v23, %v304_v22  ;;  %v394_v26 = vld [vmem:[#allocation10] sm:$0xff]  ;;  %v395_v27 = vld [vmem:[#allocation10 + $0x8] sm:$0xff]  ;;  %v397_v29 = vld [vmem:[#allocation10 + $0x18] sm:$0xff] }
  0x70   :  { %619 = vmatpush1.bf16.msra.mxu0 %v618_v34  ;;  %372 = vmatprep.mubr.f32.mxu0 %v855_v0  ;;  %v649_v28 = vpack.c.bf16 %v395_v27, %v394_v26  ;;  %v398_v31 = vld [vmem:[#allocation10 + $0x20] sm:$0xff]  ;;  %v399_v32 = vld [vmem:[#allocation10 + $0x28] sm:$0xff]  ;;  %v400_v34 = vld [vmem:[#allocation10 + $0x30] sm:$0xff] }
  0x71   :  { %621 = vmatprep.subr.bf16.mxu0 %v620_v37  ;;  %613 = vmatprep.subr.bf16.mxu1 %v856_v1  ;;  %v401_v35 = vld [vmem:[#allocation10 + $0x38] sm:$0xff]  ;;  %v402_v37 = vld [vmem:[#allocation10 + $0x40] sm:$0xff]  ;;  %v403_v38 = vld [vmem:[#allocation10 + $0x48] sm:$0xff] }
  0x72   :  { %v658_v36 = vpack.c.bf16 %v401_v35, %v400_v34  ;;  %v661_v39 = vpack.c.bf16 %v403_v38, %v402_v37  ;;  %v404_v40 = vld [vmem:[#allocation10 + $0x50] sm:$0xff]  ;;  %v405_v41 = vld [vmem:[#allocation10 + $0x58] sm:$0xff]  ;;  %v406_v43 = vld [vmem:[#allocation10 + $0x60] sm:$0xff] }
  0x73   :  { %615 = vmatpush3.bf16.msra.mxu1 %v614_v5  ;;  %v664_v42 = vpack.c.bf16 %v405_v41, %v404_v40  ;;  %v407_v44 = vld [vmem:[#allocation10 + $0x68] sm:$0xff]  ;;  %v409_v47 = vld [vmem:[#allocation10 + $0x78] sm:$0xff]  ;;  %v114_v52 = vld [vmem:[%s1018_s5] sm:$0x7]  ;;  %s858_s5 = smov [#allocation11]  }
  0x74   :  { %623 = vmatpush1.bf16.msra.mxu0 %v622_v45  ;;  %648 = vmatprep.subr.bf16.mxu1 %v856_v1  ;;  %v667_v45 = vpack.c.bf16 %v407_v44, %v406_v43  ;;  %v123_v53 = vrot.slane %v114_v52, %v122_v51  ;;  %v119_v62 = vrot.slane %v114_v52, %v118_v61  ;;  %s493_s10 = sshll.u32 %s858_s5, 4  ;;  %s494_s10 = int_to_ptr.vmem [resolvable:$true] %s493_s10 }
  0x75   :  { %625 = vmatprep.subr.bf16.mxu0 %v624_v46  ;;  %v408_v46 = vld [vmem:[#allocation10 + $0x70] sm:$0xff]  ;;  %v127_v6 = vrot.slane %v114_v52, %v126_v3  ;;  %s814_s11 = scalar_lea.vmem %s494_s10, 128  ;;  %p819_p13 = scmp.lt.s32.totalorder %s494_s10, %s494_s10 }
  0x76   :  { %551 = vmatmul.mubr.msk.f32.vlgmr.msra.gmra.mrb[0].mxu1 %vm131_vm1, %v972_v33  ;;  %v655_v33 = vpack.c.bf16 %v399_v32, %v398_v31  ;;  %v670_v48 = vpack.c.bf16 %v409_v47, %v408_v46  ;;  %p815_p12 = scmp.ne.s32.totalorder %s494_s10, %s814_s11  ;;  %p820_p0 = scmp.lt.s32.totalorder %s814_s11, %s814_s11 }
  0x77   :  { %585 = vmatprep.mubr.msk.f32.mxu1 %vm857_vm0, %v855_v0  ;;  %650 = vmatpush3.bf16.msra.mxu1 %v649_v28  ;;  %v396_v0 = vld [vmem:[#allocation10 + $0x10] sm:$0xff] }
  0x78   :  { %627 = vmatpush1.bf16.msra.mxu0 %v626_v54  ;;  %651 = vmatprep.subr.bf16.mxu1 %v856_v1  ;;  %v652_v30 = vpack.c.bf16 %v397_v29, %v396_v0  ;;  %p821_p1 = por %p820_p0, %p819_p13 }
  0x79   :  { %629 = vmatprep.subr.bf16.mxu0 %v628_v55 }
  0x7a   :  { %p822_p2 = pnand %p821_p1, %p815_p12 }
  0x7b   :  { %653 = vmatpush3.bf16.msra.mxu1 %v652_v30 }
  0x7c   :  { %631 = vmatpush1.bf16.msra.mxu0 %v630_v63  ;;  %654 = vmatprep.subr.bf16.mxu1 %v856_v1 }
  0x7d   :  { %633 = vmatprep.subr.bf16.mxu0 %v632_v2 }
  0x7f   :  { %656 = vmatpush3.bf16.msra.mxu1 %v655_v33 }
  0x80   :  { %635 = vmatpush1.bf16.msra.mxu0 %v634_v8  ;;  %657 = vmatprep.subr.bf16.mxu1 %v856_v1 }
  0x81   :  { %637 = vmatprep.subr.bf16.mxu0 %v636_v9 }
  0x83   :  { %659 = vmatpush3.bf16.msra.mxu1 %v658_v36 }
  0x84   :  { %639 = vmatpush1.bf16.msra.mxu0 %v638_v14  ;;  %660 = vmatprep.subr.bf16.mxu1 %v856_v1 }
  0x85   :  { %641 = vmatprep.subr.bf16.mxu0 %v640_v15 }
  0x87   :  { %662 = vmatpush3.bf16.msra.mxu1 %v661_v39 }
  0x88   :  { %643 = vmatpush1.bf16.msra.mxu0 %v642_v20  ;;  %663 = vmatprep.subr.bf16.mxu1 %v856_v1 }
  0x89   :  { %645 = vmatprep.subr.bf16.mxu0 %v644_v21 }
  0x8b   :  { %665 = vmatpush3.bf16.msra.mxu1 %v664_v42 }
  0x8c   :  { %647 = vmatpush1.bf16.msra.mxu0 %v646_v24  ;;  %666 = vmatprep.subr.bf16.mxu1 %v856_v1 }
  0x8f   :  { %373 = vmatmul.mubr.f32.vlgmr.msra.gmra.mrb[0].mxu0 %v985_v25  ;;  %668 = vmatpush3.bf16.msra.mxu1 %v667_v45 }
  0x90   :  { %669 = vmatprep.subr.bf16.mxu1 %v856_v1 }
  0x93   :  { %671 = vmatpush3.bf16.msra.mxu1 %v670_v48 }
 0x162   :  { %v374_v54 = vpop.f32.mrb[0].mxu0 }
 0x163   :  { %v376_v55 = vpop.f32.mrb[1].mxu0  ;;  %v672_v63 = vadd.f32 %v374_v54, %v119_v62 }
 0x164   :  { %v673_v56 = vadd.f32 %v376_v55, %v123_v53 }
 0x165   :  { %v506_v2 = vmul.f32 -1.442695, %v672_v63 }
 0x166   :  { %v507_v57 = vmul.f32 -1.442695, %v673_v56 }
 0x168   :  { %694 = vpow2.f32 %v507_v57 }
 0x172   :  { %v695_v58 = vpop.eup %694 }
 0x173   :  { %v390_v59 = vadd.f32 1.0, %v695_v58 }
 0x175   :  { %696 = vrcp.f32 %v390_v59 }
 0x176   :  { %698 = vpow2.f32 %v506_v2 }
 0x17f   :  { %v697_v1 = vpop.eup %696 }
 0x180   :  { %v393_v60 = vmul.f32 %v697_v1, %v985_v25  ;;  %v699_v4 = vpop.eup %698 }
 0x181   :  { %v383_v5 = vadd.f32 1.0, %v699_v4 }
 0x182   :  { %586 = vmatmul.mubr.f32.vlgmr.msra.gmra.mrb[0].mxu1 %v393_v60 }
 0x183   :  { %700 = vrcp.f32 %v383_v5 }
 0x18d   :  { %v701_v10 = vpop.eup %700 }
 0x18e   :  { %v482_v12 = vsub.f32 1.0, %v701_v10 }
 0x255   :  { %v476_v7 = vpop.f32.mrb[0].mxu1 }
 0x256   :  { %v674_v8 = vadd.f32 %v476_v7, %v127_v6  ;;  %v587_v9 = vpop.f32.mrb[1].mxu1 }
 0x258   :  { %702 = vtanh.f32 %v674_v8 }
 0x262   :  { %v703_v11 = vpop.eup %702 }
 0x263   :  { %v483_v13 = vsub.f32 %v703_v11, %v985_v25 }
 0x265   :  { %v484_v14 = vmul.f32 %v483_v13, %v482_v12 }
 0x267   :  { %v485_v15 = vadd.f32 %v484_v14, %v985_v25 }
 0x269   :  { %486 = vst [vmem:[#allocation11] sm:$0xff] %v485_v15 }
 0x26a   :  { %825 = shalt.err (!%p822_p2)
}
 0x26b   :  { %s826_s14 = scalar_lea.hbm %s1019_s6, 128 }
 0x26c   :  { %p827_p3 = scmp.ne.s32.totalorder %s1019_s6, %s826_s14  ;;  %p830_p4 = scmp.lt.u32.totalorder %s826_s14, %s1019_s6 }
 0x26e   :  { %p832_p5 = pnand %p830_p4, %p827_p3 }
 0x270   :  { %835 = shalt.err (!%p832_p5)
}
 0x271   :  { %496 = dma.vmem_to_hbm [thread:$0]  %s494_s10, 128, %s1019_s6, [#allocation4]  }
 0x272   :  { %842 = dma.done.wait [#allocation4], 128  }
 0x273   :  { %843 = vsyncadd [#allocation4], 4294967168 }
 0x274   :  { %500 = vsyncpa [#allocation3], 1 }
 0x275   :  { %501 = vsyncpa [#allocation6], 1 }
 0x276   :  { %502 = vsyncpa [#allocation9], 1 }
 0x277   :  { %503 = vsyncpa [#allocation4], 1 }

</bundles_post_ra>
